<compile_context>
chip_gen: v5e
topology: v5e:2x2
jax: 0.10.0
libtpu: 0.0.40
codegen_flags: <defaults>
</compile_context>

<pallas_src>
import functools

import jax
import jax.numpy as jnp
from jax.experimental import pallas as pl
from jax.experimental.pallas import tpu as pltpu


def _round_up(v: int, m: int) -> int:
    return ((v + m - 1) // m) * m


def _linear_block_kernel(x_ref, w_ref, p_ref, keep_ref, o_ref, *,
                         eps: float, batch: int, inv_keep: float,
                         tk: int, x_resident: bool):
    """One (N-tile, K-tile) grid step of Linear -> Dropout -> BatchNorm1d -> ReLU.

    p_ref packs [bias; gamma; beta] as rows of a (3, tn) block.
    The output block (B, tn) is resident across the K axis and doubles as the accumulator.
    """
    k = pl.program_id(1)

    @pl.when(k == 0)
    def _init():
        o_ref[...] = jnp.zeros_like(o_ref)

    # ---- Linear: MXU matmul, bf16 inputs / f32 accumulation into o_ref ----
    if x_resident:
        x_blk = x_ref[:, pl.ds(pl.multiple_of(k * tk, 128), tk)]
    else:
        x_blk = x_ref[...]
    o_ref[...] += jnp.dot(x_blk, w_ref[...], preferred_element_type=jnp.float32)

    @pl.when(k == pl.num_programs(1) - 1)
    def _finalize():
        bias = p_ref[0:1, :]
        gamma = p_ref[1:2, :]
        beta = p_ref[2:3, :]

        y = o_ref[...] + bias                                 # Linear bias
        # inverted dropout: {0,1} mask (bf16) * scalar 1/(1-p)
        y = y * (keep_ref[...].astype(jnp.float32) * jnp.float32(inv_keep))

        # ---- BatchNorm1d training stats (two-pass: mean, then centered SSQ) + ReLU ----
        inv_b = jnp.float32(1.0 / batch)
        mean = jnp.sum(y, axis=0, keepdims=True) * inv_b
        centered = y - mean
        var = jnp.sum(centered * centered, axis=0, keepdims=True) * inv_b  # biased variance
        scale = gamma * jax.lax.rsqrt(var + eps)              # rsqrt -> EUP slot (free)
        o_ref[...] = jnp.maximum(centered * scale + beta, 0.0).astype(o_ref.dtype)


def make_dropout_keep_mask(key, shape, dropout_p):
    """Unscaled {0,1} keep mask (f32) and the scalar inverse keep probability."""
    if dropout_p <= 0.0:
        return jnp.ones(shape, jnp.float32), 1.0
    if dropout_p >= 1.0:                       # avoid 1/(1-p) overflow
        return jnp.zeros(shape, jnp.float32), 0.0
    keep = jax.random.bernoulli(key, 1.0 - dropout_p, shape).astype(jnp.float32)
    return keep, 1.0 / (1.0 - dropout_p)


def linear_block_forward(x, w, b, gamma, beta, keep01, inv_keep, *, eps=1e-5):
    """x: (B, in_Chan); w: (in_Chan, out_Chan); b/gamma/beta: (1, out_Chan) or (out_Chan,);
    keep01: (B, out_Chan) unscaled {0,1} dropout mask; inv_keep: scalar 1/(1-p)."""
    B, K = x.shape
    N = w.shape[1]

    # ---- adaptive tile sizes ----
    n128 = _round_up(N, 128)
    tn = 256 if n128 >= 512 else 128           # keep >=2 feature tiles when possible (megacore)
    n_pad = _round_up(n128, tn)
    k128 = _round_up(K, 128)
    tk = min(512, k128)
    k_pad = _round_up(k128, tk)

    # x fully K-resident (single DMA) when small enough, else tiled along K.
    x_resident = (B * k_pad * 2) <= (4 * 1024 * 1024)

    # Zero-pad reduction/feature dims so every block is (8,128)-aligned and the output
    # tiles are lane-dense (unmasked 128-wide stores). Padding is sliced off below.
    x_p = jnp.pad(x, ((0, 0), (0, k_pad - K))).astype(jnp.bfloat16)
    w_p = jnp.pad(w, ((0, k_pad - K), (0, n_pad - N))).astype(jnp.bfloat16)
    params = jnp.concatenate([jnp.reshape(b, (1, N)),
                              jnp.reshape(gamma, (1, N)),
                              jnp.reshape(beta, (1, N))], axis=0).astype(jnp.float32)
    params_p = jnp.pad(params, ((0, 0), (0, n_pad - N)))
    keep_p = jnp.pad(keep01, ((0, 0), (0, n_pad - N))).astype(jnp.bfloat16)

    grid = (n_pad // tn, k_pad // tk)          # (feature tiles: parallel, K tiles: reduction)

    if x_resident:
        x_spec = pl.BlockSpec((B, k_pad), lambda j, k: (0, 0))   # DMA'd once, revisited
    else:
        x_spec = pl.BlockSpec((B, tk), lambda j, k: (0, k))

    kernel = functools.partial(_linear_block_kernel, eps=eps, batch=B,
                               inv_keep=float(inv_keep), tk=tk, x_resident=x_resident)

    # ---- VMEM budget (bf16 inputs, f32 output/params), with headroom, capped for v7x ----
    x_bytes = (1 if x_resident else 2) * B * (k_pad if x_resident else tk) * 2
    footprint = (x_bytes
                 + 2 * tk * tn * 2             # w double-buffer (bf16)
                 + 2 * B * tn * 2              # keep mask (bf16)
                 + 2 * 3 * tn * 4              # fused params (f32)
                 + 2 * B * tn * 4)             # output block (f32)
    vmem_limit = min(64 * 1024 * 1024, max(2 * footprint + 2 * 1024 * 1024,
                                           16 * 1024 * 1024))

    x_reads = 1 if x_resident else (n_pad // tn)
    cost = pl.CostEstimate(
        flops=2 * B * k_pad * n_pad + 10 * B * n_pad,
        transcendentals=n_pad,                 # one rsqrt per feature
        bytes_accessed=(2 * x_reads * B * k_pad            # x (bf16)
                        + 2 * k_pad * n_pad                # w (bf16)
                        + 2 * B * n_pad                    # keep mask (bf16)
                        + 4 * 3 * n_pad                    # params (f32)
                        + 4 * B * n_pad),                  # output (f32)
    )

    out = pl.pallas_call(
        kernel,
        out_shape=jax.ShapeDtypeStruct((B, n_pad), jnp.float32),
        grid_spec=pltpu.PrefetchScalarGridSpec(
            num_scalar_prefetch=0,
            grid=grid,
            in_specs=[
                x_spec,                                          # x (batch resident)
                pl.BlockSpec((tk, tn), lambda j, k: (k, j)),     # w
                pl.BlockSpec((3, tn), lambda j, k: (0, j)),      # [bias; gamma; beta]
                pl.BlockSpec((B, tn), lambda j, k: (0, j)),      # dropout keep mask {0,1}
            ],
            out_specs=pl.BlockSpec((B, tn), lambda j, k: (0, j)),
        ),
        compiler_params=pltpu.CompilerParams(
            dimension_semantics=("parallel", "arbitrary"),
            vmem_limit_bytes=vmem_limit,
        ),
        cost_estimate=cost,
    )(x_p, w_p, params_p, keep_p)

    return out[:, :N]


if __name__ == "__main__":
    # Small shapes consistent with nn.Linear(in_Chan, out_Chan) on (batch, in_Chan) input.
    batch, in_chan, out_chan = 8, 32, 64
    dropout_p = 0.2
    eps = 1e-5

    key = jax.random.PRNGKey(0)
    kx, kw, kb, kd = jax.random.split(key, 4)

    x = jax.random.normal(kx, (batch, in_chan), dtype=jnp.float32)

    # Deterministic parameter init (mirrors PyTorch's uniform(-1/sqrt(fan_in), 1/sqrt(fan_in))).
    bound = 1.0 / (in_chan ** 0.5)
    w = jax.random.uniform(kw, (in_chan, out_chan), minval=-bound, maxval=bound,
                           dtype=jnp.float32)
    b = jax.random.uniform(kb, (1, out_chan), minval=-bound, maxval=bound,
                           dtype=jnp.float32)
    gamma = jnp.ones((1, out_chan), dtype=jnp.float32)   # BatchNorm1d weight
    beta = jnp.zeros((1, out_chan), dtype=jnp.float32)   # BatchNorm1d bias

    keep01, inv_keep = make_dropout_keep_mask(kd, (batch, out_chan), dropout_p)

    out = linear_block_forward(x, w, b, gamma, beta, keep01, inv_keep, eps=eps)
    out = jax.block_until_ready(out)

    # Pure-JAX reference using the identical dropout mask (f32 matmul).
    y = x @ w + b
    y = y * (keep01 * inv_keep)
    mean = jnp.mean(y, axis=0, keepdims=True)
    var = jnp.mean((y - mean) ** 2, axis=0, keepdims=True)
    ref = jnp.maximum((y - mean) * jax.lax.rsqrt(var + eps) * gamma + beta, 0.0)

    assert out.shape == (batch, out_chan)
    assert bool(jnp.all(out >= 0.0))                       # ReLU post-condition
    assert bool(jnp.all(jnp.isfinite(out)))
    assert float(jnp.max(jnp.abs(out - ref))) < 0.1        # bf16-matmul tolerance
    print("KERNEL_OK")
</pallas_src>

<mosaic_0001>
module attributes {stable_mosaic.version = 11 : i64} {
  func.func @_linear_block_kernel(%arg0: i32, %arg1: i32, %arg2: memref<8x128xbf16, #tpu.memory_space<vmem>>, %arg3: memref<128x128xbf16, #tpu.memory_space<vmem>>, %arg4: memref<3x128xf32, #tpu.memory_space<vmem>>, %arg5: memref<8x128xbf16, #tpu.memory_space<vmem>>, %arg6: memref<8x128xf32, #tpu.memory_space<vmem>>) attributes {dimension_semantics = [#tpu.dimension_semantics<parallel>, #tpu.dimension_semantics<arbitrary>], iteration_bounds = array<i64: 1, 1>, scalar_prefetch = 0 : i64, scratch_operands = 0 : i64, tpu.core_type = #tpu.core_type<tc>, window_params = [{pipeline_mode = #tpu.pipeline_mode<synchronous>, transform_indices = @transform_0, window_bounds = array<i64: 8, 128>}, {transform_indices = @transform_1, window_bounds = array<i64: 128, 128>}, {transform_indices = @transform_2, window_bounds = array<i64: 3, 128>}, {transform_indices = @transform_3, window_bounds = array<i64: 8, 128>}, {transform_indices = @transform_4, window_bounds = array<i64: 8, 128>}]} {
    %c0_i32 = arith.constant 0 : i32
    %0 = arith.cmpi eq, %arg1, %c0_i32 : i32
    %1 = arith.extui %0 : i1 to i32
    %c0_i32_0 = arith.constant 0 : i32
    %2 = arith.cmpi ne, %1, %c0_i32_0 : i32
    scf.if %2 {
      %cst_9 = arith.constant 0.000000e+00 : f32
      %15 = vector.broadcast %cst_9 : f32 to vector<8x128xf32>
      %c0_10 = arith.constant 0 : index
      %c0_11 = arith.constant 0 : index
      %16 = vector.load %arg6[%c0_10, %c0_11] : memref<8x128xf32, #tpu.memory_space<vmem>>, vector<8x128xf32>
      tpu.vector_store %arg6[%c0_10, %c0_11], %15 {strides = array<i32>} : memref<8x128xf32, #tpu.memory_space<vmem>>, vector<8x128xf32>,
    } else {
    }
    %c128_i32 = arith.constant 128 : i32
    %3 = arith.muli %arg1, %c128_i32 : i32
    %4 = tpu.assume_multiple %3, 128 : i32
    %c0 = arith.constant 0 : index
    %5 = arith.index_cast %4 : i32 to index
    %6 = vector.load %arg2[%c0, %5] : memref<8x128xbf16, #tpu.memory_space<vmem>>, vector<8x128xbf16>
    %c0_1 = arith.constant 0 : index
    %c0_2 = arith.constant 0 : index
    %7 = vector.load %arg6[%c0_1, %c0_2] : memref<8x128xf32, #tpu.memory_space<vmem>>, vector<8x128xf32>
    %c0_3 = arith.constant 0 : index
    %c0_4 = arith.constant 0 : index
    %8 = vector.load %arg3[%c0_3, %c0_4] : memref<128x128xbf16, #tpu.memory_space<vmem>>, vector<128x128xbf16>
    %cst = arith.constant dense<0.000000e+00> : vector<8x128xf32>
    %9 = tpu.matmul %6, %8, %cst {dimension_numbers = #tpu.dot_dimension_numbers<[1], [0], [0], [1], [0, 0, 1, 1], [], []>} : vector<8x128xbf16>, vector<128x128xbf16>, vector<8x128xf32> -> vector<8x128xf32>
    %10 = arith.addf %7, %9 : vector<8x128xf32>
    %c0_5 = arith.constant 0 : index
    %c0_6 = arith.constant 0 : index
    %11 = vector.load %arg6[%c0_5, %c0_6] : memref<8x128xf32, #tpu.memory_space<vmem>>, vector<8x128xf32>
    tpu.vector_store %arg6[%c0_5, %c0_6], %10 {strides = array<i32>} : memref<8x128xf32, #tpu.memory_space<vmem>>, vector<8x128xf32>,
    %c0_i32_7 = arith.constant 0 : i32
    %12 = arith.cmpi eq, %arg1, %c0_i32_7 : i32
    %13 = arith.extui %12 : i1 to i32
    %c0_i32_8 = arith.constant 0 : i32
    %14 = arith.cmpi ne, %13, %c0_i32_8 : i32
    scf.if %14 {
      %c0_9 = arith.constant 0 : index
      %c0_10 = arith.constant 0 : index
      %15 = vector.load %arg4[%c0_9, %c0_10] : memref<3x128xf32, #tpu.memory_space<vmem>>, vector<1x128xf32>
      %c1 = arith.constant 1 : index
      %c0_11 = arith.constant 0 : index
      %16 = vector.load %arg4[%c1, %c0_11] : memref<3x128xf32, #tpu.memory_space<vmem>>, vector<1x128xf32>
      %c2 = arith.constant 2 : index
      %c0_12 = arith.constant 0 : index
      %17 = vector.load %arg4[%c2, %c0_12] : memref<3x128xf32, #tpu.memory_space<vmem>>, vector<1x128xf32>
      %c0_13 = arith.constant 0 : index
      %c0_14 = arith.constant 0 : index
      %18 = vector.load %arg6[%c0_13, %c0_14] : memref<8x128xf32, #tpu.memory_space<vmem>>, vector<8x128xf32>
      %19 = vector.broadcast %15 : vector<1x128xf32> to vector<8x128xf32>
      %20 = arith.addf %18, %19 : vector<8x128xf32>
      %c0_15 = arith.constant 0 : index
      %c0_16 = arith.constant 0 : index
      %21 = vector.load %arg5[%c0_15, %c0_16] : memref<8x128xbf16, #tpu.memory_space<vmem>>, vector<8x128xbf16>
      %22 = arith.extf %21 : vector<8x128xbf16> to vector<8x128xf32>
      %cst_17 = arith.constant 1.250000e+00 : f32
      %23 = vector.broadcast %cst_17 : f32 to vector<8x128xf32>
      %24 = arith.mulf %22, %23 : vector<8x128xf32>
      %25 = arith.mulf %20, %24 : vector<8x128xf32>
      %cst_18 = arith.constant dense<0.000000e+00> : vector<128xf32>
      %26 = vector.multi_reduction <add>, %25, %cst_18 [0] : vector<8x128xf32> to vector<128xf32>
      %27 = vector.shape_cast %26 : vector<128xf32> to vector<1x128xf32>
      %cst_19 = arith.constant 1.250000e-01 : f32
      %28 = vector.broadcast %cst_19 : f32 to vector<1x128xf32>
      %29 = arith.mulf %27, %28 : vector<1x128xf32>
      %30 = vector.broadcast %29 : vector<1x128xf32> to vector<8x128xf32>
      %31 = arith.subf %25, %30 : vector<8x128xf32>
      %32 = arith.mulf %31, %31 : vector<8x128xf32>
      %cst_20 = arith.constant dense<0.000000e+00> : vector<128xf32>
      %33 = vector.multi_reduction <add>, %32, %cst_20 [0] : vector<8x128xf32> to vector<128xf32>
      %34 = vector.shape_cast %33 : vector<128xf32> to vector<1x128xf32>
      %cst_21 = arith.constant 1.250000e-01 : f32
      %35 = vector.broadcast %cst_21 : f32 to vector<1x128xf32>
      %36 = arith.mulf %34, %35 : vector<1x128xf32>
      %cst_22 = arith.constant 9.99999974E-6 : f32
      %37 = vector.broadcast %cst_22 : f32 to vector<1x128xf32>
      %38 = arith.addf %36, %37 : vector<1x128xf32>
      %39 = math.rsqrt %38 : vector<1x128xf32>
      %40 = arith.mulf %16, %39 : vector<1x128xf32>
      %41 = vector.broadcast %40 : vector<1x128xf32> to vector<8x128xf32>
      %42 = arith.mulf %31, %41 : vector<8x128xf32>
      %43 = vector.broadcast %17 : vector<1x128xf32> to vector<8x128xf32>
      %44 = arith.addf %42, %43 : vector<8x128xf32>
      %cst_23 = arith.constant 0.000000e+00 : f32
      %45 = vector.broadcast %cst_23 : f32 to vector<8x128xf32>
      %46 = arith.maximumf %44, %45 : vector<8x128xf32>
      %c0_24 = arith.constant 0 : index
      %c0_25 = arith.constant 0 : index
      %47 = vector.load %arg6[%c0_24, %c0_25] : memref<8x128xf32, #tpu.memory_space<vmem>>, vector<8x128xf32>
      tpu.vector_store %arg6[%c0_24, %c0_25], %46 {strides = array<i32>} : memref<8x128xf32, #tpu.memory_space<vmem>>, vector<8x128xf32>,
    } else {
    }
    return
  }
  func.func @transform_0(%arg0: i32, %arg1: i32) -> (i32, i32) {
    %c0_i32 = arith.constant 0 : i32
    %c0_i32_0 = arith.constant 0 : i32
    %c0_i32_1 = arith.constant 0 : i32
    return %c0_i32, %c0_i32_0 : i32, i32
  }
  func.func @transform_1(%arg0: i32, %arg1: i32) -> (i32, i32) {
    %c0_i32 = arith.constant 0 : i32
    return %arg1, %arg0 : i32, i32
  }
  func.func @transform_2(%arg0: i32, %arg1: i32) -> (i32, i32) {
    %c0_i32 = arith.constant 0 : i32
    %c0_i32_0 = arith.constant 0 : i32
    return %c0_i32, %arg0 : i32, i32
  }
  func.func @transform_3(%arg0: i32, %arg1: i32) -> (i32, i32) {
    %c0_i32 = arith.constant 0 : i32
    %c0_i32_0 = arith.constant 0 : i32
    return %c0_i32, %arg0 : i32, i32
  }
  func.func @transform_4(%arg0: i32, %arg1: i32) -> (i32, i32) {
    %c0_i32 = arith.constant 0 : i32
    %c0_i32_0 = arith.constant 0 : i32
    return %c0_i32, %arg0 : i32, i32
  }
}

</mosaic_0001>

<bundles_post_ra>
// kernel: tpu_custom_call.1
= control target key start
LH: loop header
LB: loop body
LE: loop exit
PB: predicated region body
PF: predicated region fallthrough
CT: control target
= control target key end

     0   :  { %9 = vsyncpa [#allocation3], 0  ;;  %s461_s0 = inlined_call_operand.hbm [shape: bf16[8,128], index: 0, kind: input, shape index: {}]   ;;  %s462_s1 = inlined_call_operand.hbm [shape: bf16[128,128], index: 1, kind: input, shape index: {}]   ;;  %s463_s2 = inlined_call_operand.hbm [shape: f32[3,128], index: 2, kind: input, shape index: {}]   ;;  %s464_s3 = inlined_call_operand.hbm [shape: bf16[8,128], index: 3, kind: input, shape index: {}]   ;;  %s465_s4 = inlined_call_operand.hbm [shape: f32[8,128], index: 4, kind: output, shape index: {}]  }
   0x1   :  { %10 = vsyncpa [#allocation6], 0 }
   0x2   :  { %11 = vsyncpa [#allocation9], 0  ;;  %s28_s17 = sshll.u32 %s462_s1, 4  ;;  %s29_s17 = int_to_ptr.hbm [resolvable:$true] %s28_s17 }
   0x3   :  { %12 = vsyncpa [#allocation4], 0  ;;  %s414_s18 = smov [#allocation5]   ;;  %s18_s22 = sshll.u32 %s461_s0, 4  ;;  %s19_s22 = int_to_ptr.hbm [resolvable:$true] %s18_s22 }
   0x4   :  { %s30_s19 = sshll.u32 %s414_s18, 4  ;;  %s415_s23 = smov 64   ;;  %s31_s19 = int_to_ptr.vmem [resolvable:$true] %s30_s19 }
   0x5   :  { %s416_s24 = smov 4   ;;  %s417_s25 = smov [#allocation2]  }
   0x6   :  { %36 = dma.hbm_to_vmem [thread:$0]  %s29_s17, 1024, %s31_s19, [#allocation6], %s415_s23, %s415_s23, %s416_s24  }
   0x7   :  { %s20_s26 = sshll.u32 %s417_s25, 4  ;;  %s42_s29 = sshll.u32 %s463_s2, 4  ;;  %s21_s26 = int_to_ptr.vmem [resolvable:$true] %s20_s26  ;;  %s43_s29 = int_to_ptr.hbm [resolvable:$true] %s42_s29 }
   0x8   :  { %23 = dma.hbm_to_vmem [thread:$0]  %s19_s22, 64, %s21_s26, [#allocation3]  }
   0x9   :  { %s53_s5 = sshll.u32 %s464_s3, 4  ;;  %s418_s6 = smov [#allocation7]   ;;  %s54_s5 = int_to_ptr.hbm [resolvable:$true] %s53_s5 }
   0xa   :  { %s44_s7 = sshll.u32 %s418_s6, 4  ;;  %s419_s0 = smov [#allocation8]   ;;  %s45_s7 = int_to_ptr.vmem [resolvable:$true] %s44_s7 }
   0xb   :  { %47 = dma.hbm_to_vmem [thread:$0]  %s43_s29, 64, %s45_s7, [#allocation6]  }
   0xc   :  { %s55_s8 = sshll.u32 %s419_s0, 4  ;;  %s56_s8 = int_to_ptr.vmem [resolvable:$true] %s55_s8 }
   0xd   :  { %58 = dma.hbm_to_vmem [thread:$0]  %s54_s5, 64, %s56_s8, [#allocation9]  }
   0xe   :  { %406 = dma.done.wait [#allocation3], 64  }
   0xf   :  { %407 = vsyncadd [#allocation3], 4294967232 }
  0x10   :  { %408 = dma.done.wait [#allocation6], 1088  }
  0x11   :  { %409 = vsyncadd [#allocation6], 4294966208 }
  0x12   :  { %410 = dma.done.wait [#allocation9], 64  }
  0x13   :  { %411 = vsyncadd [#allocation9], 4294967232  ;;  %v273_v0 = vld [vmem:[#allocation5 + $0x38] sm:$0xff]  ;;  %v272_v1 = vld [vmem:[#allocation5 + $0x30] sm:$0xff]  ;;  %s420_s2 = smov [#allocation10]   ;;  %s220_s11 = sshll.u32 %s465_s4, 4  ;;  %s221_s11 = int_to_ptr.hbm [resolvable:$true] %s220_s11 }
  0x14   :  { %151 = vmatpush.bf16.msra.mxu0 %v273_v0  ;;  %v271_v2 = vld [vmem:[#allocation5 + $0x28] sm:$0xff]  ;;  %v270_v3 = vld [vmem:[#allocation5 + $0x20] sm:$0xff]  ;;  %v269_v4 = vld [vmem:[#allocation5 + $0x18] sm:$0xff]  ;;  %s218_s3 = sshll.u32 %s420_s2, 4  ;;  %s219_s3 = int_to_ptr.vmem [resolvable:$true] %s218_s3 }
  0x15   :  { %v268_v5 = vld [vmem:[#allocation5 + $0x10] sm:$0xff]  ;;  %v267_v6 = vld [vmem:[#allocation5 + $0x8] sm:$0xff]  ;;  %v266_v7 = vld [vmem:[#allocation5] sm:$0xff] }
  0x16   :  { %v85_v8 = vld [vmem:[#allocation2] sm:$0xf]  ;;  %v175_v9 = vld [vmem:[#allocation8] sm:$0xf]  ;;  %v282_v11 = vld [vmem:[#allocation7] ss:$0 sm:$0xff] }
  0x17   :  { %v176_v10 = vunpack.c.l.bf16 %v175_v9  ;;  %v170_v39 = vld [vmem:[#allocation7 + $0x1] sm:$0x1]  ;;  %v283_v44 = vld [vmem:[#allocation7 + $0x2] ss:$0 sm:$0xff] }
  0x18   :  { %152 = vmatpush.bf16.msra.mxu0 %v272_v1 }
  0x19   :  { %v177_v13 = vmul.f32 1.25, %v176_v10 }
  0x1c   :  { %153 = vmatpush.bf16.msra.mxu0 %v271_v2 }
  0x20   :  { %154 = vmatpush.bf16.msra.mxu0 %v270_v3 }
  0x24   :  { %155 = vmatpush.bf16.msra.mxu0 %v269_v4 }
  0x28   :  { %156 = vmatpush.bf16.msra.mxu0 %v268_v5 }
  0x2c   :  { %157 = vmatpush.bf16.msra.mxu0 %v267_v6 }
  0x30   :  { %158 = vmatpush.bf16.msra.mxu0 %v266_v7 }
  0x33   :  { %159 = vmatmul.bf16.vlgmr.msra.gmra.mxu0 %v85_v8 }
  0xb0   :  { %v160_v12 = vpop.f32.mrf.mxu0 }
  0xb1   :  { %v174_v14 = vadd.f32 %v282_v11, %v160_v12 }
  0xb3   :  { %v178_v15 = vmul.f32 %v177_v13, %v174_v14 }
  0xb5   :  { %v179_v16 = vrot.slane %v178_v15, 4 }
  0xb7   :  { %v180_v18 = vadd.f32 %v179_v16, %v178_v15 }
  0xb8   :  { %v162_v17 = vpop.f32.mrf.mxu0 }
  0xb9   :  { %v181_v19 = vrot.slane %v180_v18, 2 }
  0xbb   :  { %v182_v20 = vadd.f32 %v181_v19, %v180_v18 }
  0xbd   :  { %v183_v21 = vrot.slane %v182_v20, 1 }
  0xbf   :  { %v184_v22 = vadd.f32 %v183_v21, %v182_v20 }
  0xc1   :  { %v185_v23 = vmul.f32 0.125, %v184_v22 }
  0xc3   :  { %v186_v24 = vsub.f32 %v178_v15, %v185_v23 }
  0xc5   :  { %v187_v25 = vmul.f32 %v186_v24, %v186_v24 }
  0xc7   :  { %v188_v26 = vrot.slane %v187_v25, 4 }
  0xc9   :  { %v189_v27 = vadd.f32 %v188_v26, %v187_v25 }
  0xcb   :  { %v190_v28 = vrot.slane %v189_v27, 2 }
  0xcd   :  { %v191_v29 = vadd.f32 %v190_v28, %v189_v27 }
  0xcf   :  { %v192_v30 = vrot.slane %v191_v29, 1 }
  0xd1   :  { %v193_v31 = vadd.f32 %v192_v30, %v191_v29 }
  0xd3   :  { %v194_v32 = vmul.f32 0.125, %v193_v31 }
  0xd5   :  { %v195_v33 = vadd.f32 1e-05, %v194_v32 }
  0xd7   :  { %284 = vrsqrt.f32 %v195_v33  ;;  %vm202_vm1 = vweird.f32 %v195_v33 }
  0xdd   :  { %v285_v34 = vpop.eup %284 }
  0xde   :  { %v197_v35 = vmul.f32 %v285_v34, %v195_v33  ;;  %vm203_vm0 = vweird.f32 %v285_v34 }
  0xdf   :  { %vm204_vm2 = vmor %vm202_vm1, %vm203_vm0 }
  0xe0   :  { %v198_v36 = vmul.f32 %v285_v34, %v197_v35 }
  0xe2   :  { %v199_v37 = vmul.f32 0.5, %v198_v36 }
  0xe4   :  { %v200_v38 = vsub.f32 1.5, %v199_v37 }
  0xe6   :  { %v201_v40 = vmul.f32 %v285_v34, %v200_v38 }
  0xe8   :  { %v205_v41 = vsel %vm204_vm2, %v285_v34, %v201_v40 }
  0xe9   :  { %v206_v42 = vmul.f32 %v205_v41, %v170_v39 }
  0xeb   :  { %v207_v43 = vperm.slane %v206_v42, 0 }
  0xed   :  { %v208_v45 = vmul.f32 %v207_v43, %v186_v24 }
  0xef   :  { %v210_v46 = vadd.f32 %v283_v44, %v208_v45 }
  0xf1   :  { %v211_v47 = vmax.f32 %v210_v46, 0.0 }
  0xf3   :  { %212 = vst [vmem:[#allocation10] sm:$0xff] %v211_v47 }
  0xf4   :  { %223 = dma.vmem_to_hbm [thread:$0]  %s219_s3, 128, %s221_s11, [#allocation4]  }
  0xf5   :  { %412 = dma.done.wait [#allocation4], 128  }
  0xf6   :  { %413 = vsyncadd [#allocation4], 4294967168 }
  0xf7   :  { %228 = vsyncpa [#allocation3], 1 }
  0xf8   :  { %229 = vsyncpa [#allocation6], 1 }
  0xf9   :  { %230 = vsyncpa [#allocation9], 1 }
  0xfa   :  { %231 = vsyncpa [#allocation4], 1 }

</bundles_post_ra>
